<compile_context>
chip_gen: v7x
topology: tpu7x:2x2x1
jax: 0.10.0
libtpu: 0.0.40
codegen_flags: <defaults>
</compile_context>

<pallas_src>
import functools

import jax
import jax.numpy as jnp
from jax.experimental import pallas as pl
from jax.experimental.pallas import tpu as pltpu


def _ce_ftl_kernel(logits_ref, labels_ref, out_ref,
                   ce_acc, cnt_acc, tp_acc,
                   *, smooth, alpha, gamma, ignore_index, hw):
    n = pl.program_id(0)
    i = pl.program_id(1)

    @pl.when((n == 0) & (i == 0))
    def _init():
        ce_acc[...] = jnp.zeros_like(ce_acc)
        cnt_acc[...] = jnp.zeros_like(cnt_acc)
        tp_acc[...] = jnp.zeros_like(tp_acc)

    logits = logits_ref[...].astype(jnp.float32)            # (C, T)
    labels = labels_ref[...]                                 # (1, T) int32
    C, T = logits.shape

    # valid = not ignored AND inside the real image (masks the OOB tail tile).
    col = jax.lax.broadcasted_iota(jnp.int32, (1, T), 1) + i * T
    valid = (labels != ignore_index) & (col < hw)            # (1, T) bool

    # numerically stable softmax pieces over the class (sublane) axis
    m = jnp.max(logits, axis=0, keepdims=True)               # (1, T)
    z = logits - m                                           # (C, T)
    s = jnp.sum(jnp.exp(z), axis=0, keepdims=True)           # (1, T)
    log_s = jnp.log(s)                                       # (1, T)

    class_ids = jax.lax.broadcasted_iota(jnp.int32, (C, T), 0)
    onehot = (class_ids == labels)                           # (C, T) bool
    # gather the label logit (shifted): z[label]  (single masked class-reduce)
    z_lab = jnp.sum(jnp.where(onehot, z, 0.0), axis=0, keepdims=True)  # (1, T)

    nll = log_s - z_lab                                      # -log_softmax[label]
    sm_lab = jnp.exp(-nll)                                   # softmax[label], no divide

    # per-lane partial accumulators (pure VPU adds; jnp.where keeps any
    # garbage/NaN from out-of-bounds reads out of the sums)
    ce_acc[...] += jnp.where(valid, nll, 0.0)
    cnt_acc[...] += valid.astype(jnp.float32)
    tp_acc[...] += jnp.where(valid, sm_lab, 0.0)

    @pl.when((n == pl.num_programs(0) - 1) & (i == pl.num_programs(1) - 1))
    def _finalize():
        ce_sum = jnp.sum(ce_acc[...], keepdims=True)         # (1, 1)
        cnt = jnp.sum(cnt_acc[...], keepdims=True)
        tp = jnp.sum(tp_acc[...], keepdims=True)
        # sum_c onehot = valid and sum_c softmax = 1  =>  fn = fp = cnt - tp
        fn = cnt - tp
        fp = cnt - tp
        ce = ce_sum / cnt
        ti = (tp + smooth) / (tp + alpha * fn + (1.0 - alpha) * fp + smooth)
        ftl = jnp.power(1.0 - ti, gamma)
        out_ref[...] = (ce + ftl).astype(out_ref.dtype)


def _pick_tile_p(hw, c, requested):
    # never larger than the (128-aligned) pixel count per image
    t = min(int(requested), pl.cdiv(hw, 128) * 128)
    # keep a single (C, tile_p) f32 block at <= ~2 MiB so double-buffered
    # inputs + elementwise intermediates fit scoped VMEM on v5e/v6e/v7x alike
    max_by_vmem = (2 * 1024 * 1024) // (c * 4)
    if max_by_vmem >= 128:
        t = min(t, (max_by_vmem // 128) * 128)
    return max(t, 128)


def cross_entropy_focal_tversky_loss(logits_nchw, labels_nhw, *,
                                     smooth=1.0, alpha=0.7, gamma=0.8,
                                     ignore_index=255, tile_p=32768):
    N, C, H, W = logits_nchw.shape
    HW = H * W

    tile = _pick_tile_p(HW, C, tile_p)
    num_tiles = pl.cdiv(HW, tile)

    # free reshapes (no data movement): NCHW -> (N, C, HW); labels -> (N, 1, HW)
    logits = logits_nchw.reshape(N, C, HW)
    labels = labels_nhw.reshape(N, 1, HW).astype(jnp.int32)

    kernel = functools.partial(
        _ce_ftl_kernel, smooth=float(smooth), alpha=float(alpha),
        gamma=float(gamma), ignore_index=int(ignore_index), hw=int(HW))

    out = pl.pallas_call(
        kernel,
        out_shape=jax.ShapeDtypeStruct((1, 1), jnp.float32),
        grid_spec=pltpu.PrefetchScalarGridSpec(
            num_scalar_prefetch=0,
            grid=(N, num_tiles),
            in_specs=[
                pl.BlockSpec((None, C, tile), lambda n, i: (n, 0, i)),
                pl.BlockSpec((None, 1, tile), lambda n, i: (n, 0, i)),
            ],
            out_specs=pl.BlockSpec((1, 1), lambda n, i: (0, 0)),
            scratch_shapes=[pltpu.VMEM((1, tile), jnp.float32)] * 3,
        ),
        compiler_params=pltpu.CompilerParams(
            dimension_semantics=("arbitrary", "arbitrary"),
            vmem_limit_bytes=32 * 1024 * 1024),
    )(logits, labels)
    return out[0, 0]


def _reference_loss(logits, labels, *, smooth=1.0, alpha=0.7, gamma=0.8,
                    ignore_index=255):
    N, C, H, W = logits.shape
    lp = jnp.transpose(logits, (0, 2, 3, 1)).reshape(-1, C).astype(jnp.float32)
    lab = labels.reshape(-1).astype(jnp.int32)
    valid = (lab != ignore_index).astype(jnp.float32)

    log_sm = jax.nn.log_softmax(lp, axis=-1)
    safe_lab = jnp.where(lab != ignore_index, lab, 0)
    nll = -jnp.take_along_axis(log_sm, safe_lab[:, None], axis=-1)[:, 0]
    ce = jnp.sum(nll * valid) / jnp.sum(valid)

    sm = jax.nn.softmax(lp, axis=-1)
    onehot = jax.nn.one_hot(lab, C, dtype=jnp.float32) * valid[:, None]
    sm_v = sm * valid[:, None]
    tp = jnp.sum(onehot * sm)
    fn = jnp.sum(onehot * (1.0 - sm) * valid[:, None])
    fp = jnp.sum((1.0 - onehot) * sm_v)
    ti = (tp + smooth) / (tp + alpha * fn + (1.0 - alpha) * fp + smooth)
    return ce + jnp.power(1.0 - ti, gamma)


if __name__ == "__main__":
    NUM_CLASSES = 4
    key = jax.random.PRNGKey(0)
    k_logits, k_labels = jax.random.split(key)

    logits = jax.random.normal(k_logits, (2, NUM_CLASSES, 16, 16), jnp.float32)
    labels = jax.random.randint(k_labels, (2, 16, 16), 0, NUM_CLASSES,
                                dtype=jnp.int32)
    # a few ignored pixels to exercise ignore_index=255
    labels = labels.at[0, :2, :].set(255)

    loss = cross_entropy_focal_tversky_loss(logits, labels)
    loss = jax.block_until_ready(loss)

    ref = jax.block_until_ready(_reference_loss(logits, labels))
    assert jnp.allclose(loss, ref, rtol=1e-5, atol=1e-5), (loss, ref)

    print("KERNEL_OK")
</pallas_src>

<mosaic_0001>
module attributes {stable_mosaic.version = 11 : i64} {
  func.func @_ce_ftl_kernel(%arg0: i32, %arg1: i32, %arg2: memref<1x4x256xf32, #tpu.memory_space<vmem>>, %arg3: memref<1x1x256xi32, #tpu.memory_space<vmem>>, %arg4: memref<1x1xf32, #tpu.memory_space<vmem>>, %arg5: memref<1x256xf32, #tpu.memory_space<vmem>>, %arg6: memref<1x256xf32, #tpu.memory_space<vmem>>, %arg7: memref<1x256xf32, #tpu.memory_space<vmem>>) attributes {dimension_semantics = [#tpu.dimension_semantics<arbitrary>, #tpu.dimension_semantics<arbitrary>], iteration_bounds = array<i64: 2, 1>, scalar_prefetch = 0 : i64, scratch_operands = 3 : i64, tpu.core_type = #tpu.core_type<tc>, window_params = [{transform_indices = @transform_0, window_bounds = array<i64: 1, 4, 256>}, {transform_indices = @transform_1, window_bounds = array<i64: 1, 1, 256>}, {pipeline_mode = #tpu.pipeline_mode<synchronous>, transform_indices = @transform_2, window_bounds = array<i64: 1, 1>}]} {
    %c0_i32 = arith.constant 0 : i32
    %0 = arith.cmpi eq, %arg0, %c0_i32 : i32
    %c0_i32_0 = arith.constant 0 : i32
    %1 = arith.cmpi eq, %arg1, %c0_i32_0 : i32
    %2 = arith.andi %0, %1 : i1
    %3 = arith.extui %2 : i1 to i32
    %c0_i32_1 = arith.constant 0 : i32
    %4 = arith.cmpi ne, %3, %c0_i32_1 : i32
    scf.if %4 {
      %cst_28 = arith.constant 0.000000e+00 : f32
      %57 = vector.broadcast %cst_28 : f32 to vector<1x256xf32>
      %c0_29 = arith.constant 0 : index
      %c0_30 = arith.constant 0 : index
      %58 = vector.load %arg5[%c0_29, %c0_30] : memref<1x256xf32, #tpu.memory_space<vmem>>, vector<1x256xf32>
      tpu.vector_store %arg5[%c0_29, %c0_30], %57 {strides = array<i32>} : memref<1x256xf32, #tpu.memory_space<vmem>>, vector<1x256xf32>,
      %cst_31 = arith.constant 0.000000e+00 : f32
      %59 = vector.broadcast %cst_31 : f32 to vector<1x256xf32>
      %c0_32 = arith.constant 0 : index
      %c0_33 = arith.constant 0 : index
      %60 = vector.load %arg6[%c0_32, %c0_33] : memref<1x256xf32, #tpu.memory_space<vmem>>, vector<1x256xf32>
      tpu.vector_store %arg6[%c0_32, %c0_33], %59 {strides = array<i32>} : memref<1x256xf32, #tpu.memory_space<vmem>>, vector<1x256xf32>,
      %cst_34 = arith.constant 0.000000e+00 : f32
      %61 = vector.broadcast %cst_34 : f32 to vector<1x256xf32>
      %c0_35 = arith.constant 0 : index
      %c0_36 = arith.constant 0 : index
      %62 = vector.load %arg7[%c0_35, %c0_36] : memref<1x256xf32, #tpu.memory_space<vmem>>, vector<1x256xf32>
      tpu.vector_store %arg7[%c0_35, %c0_36], %61 {strides = array<i32>} : memref<1x256xf32, #tpu.memory_space<vmem>>, vector<1x256xf32>,
    } else {
    }
    %c0 = arith.constant 0 : index
    %c0_2 = arith.constant 0 : index
    %c0_3 = arith.constant 0 : index
    %5 = vector.load %arg2[%c0, %c0_2, %c0_3] : memref<1x4x256xf32, #tpu.memory_space<vmem>>, vector<1x4x256xf32>
    %6 = vector.shape_cast %5 : vector<1x4x256xf32> to vector<4x256xf32>
    %c0_4 = arith.constant 0 : index
    %c0_5 = arith.constant 0 : index
    %c0_6 = arith.constant 0 : index
    %7 = vector.load %arg3[%c0_4, %c0_5, %c0_6] : memref<1x1x256xi32, #tpu.memory_space<vmem>>, vector<1x1x256xi32>
    %8 = vector.shape_cast %7 : vector<1x1x256xi32> to vector<1x256xi32>
    %9 = tpu.iota {dimensions = array<i32: 1>} : vector<1x256xi32>
    %c256_i32 = arith.constant 256 : i32
    %10 = arith.muli %arg1, %c256_i32 : i32
    %11 = vector.broadcast %10 : i32 to vector<1x256xi32>
    %12 = arith.addi %9, %11 : vector<1x256xi32>
    %c255_i32 = arith.constant 255 : i32
    %13 = vector.broadcast %c255_i32 : i32 to vector<1x256xi32>
    %14 = arith.cmpi ne, %8, %13 : vector<1x256xi32>
    %c256_i32_7 = arith.constant 256 : i32
    %15 = vector.broadcast %c256_i32_7 : i32 to vector<1x256xi32>
    %16 = arith.cmpi slt, %12, %15 : vector<1x256xi32>
    %17 = arith.andi %14, %16 : vector<1x256xi1>
    %cst = arith.constant dense<0xFF800000> : vector<256xf32>
    %18 = vector.multi_reduction <maximumf>, %6, %cst [0] : vector<4x256xf32> to vector<256xf32>
    %19 = vector.shape_cast %18 : vector<256xf32> to vector<1x256xf32>
    %20 = vector.broadcast %19 : vector<1x256xf32> to vector<4x256xf32>
    %21 = arith.subf %6, %20 : vector<4x256xf32>
    %22 = math.exp %21 : vector<4x256xf32>
    %cst_8 = arith.constant dense<0.000000e+00> : vector<256xf32>
    %23 = vector.multi_reduction <add>, %22, %cst_8 [0] : vector<4x256xf32> to vector<256xf32>
    %24 = vector.shape_cast %23 : vector<256xf32> to vector<1x256xf32>
    %25 = math.log %24 : vector<1x256xf32>
    %26 = tpu.iota {dimensions = array<i32: 0>} : vector<4x256xi32>
    %27 = vector.broadcast %8 : vector<1x256xi32> to vector<4x256xi32>
    %28 = arith.cmpi eq, %26, %27 : vector<4x256xi32>
    %cst_9 = arith.constant 0.000000e+00 : f32
    %29 = vector.broadcast %cst_9 : f32 to vector<4x256xf32>
    %30 = arith.select %28, %21, %29 : vector<4x256xi1>, vector<4x256xf32>
    %cst_10 = arith.constant dense<0.000000e+00> : vector<256xf32>
    %31 = vector.multi_reduction <add>, %30, %cst_10 [0] : vector<4x256xf32> to vector<256xf32>
    %32 = vector.shape_cast %31 : vector<256xf32> to vector<1x256xf32>
    %33 = arith.subf %25, %32 : vector<1x256xf32>
    %cst_11 = arith.constant 0.000000e+00 : f32
    %34 = vector.broadcast %cst_11 : f32 to vector<1x256xf32>
    %35 = arith.subf %34, %33 : vector<1x256xf32>
    %36 = math.exp %35 : vector<1x256xf32>
    %c0_12 = arith.constant 0 : index
    %c0_13 = arith.constant 0 : index
    %37 = vector.load %arg5[%c0_12, %c0_13] : memref<1x256xf32, #tpu.memory_space<vmem>>, vector<1x256xf32>
    %cst_14 = arith.constant 0.000000e+00 : f32
    %38 = vector.broadcast %cst_14 : f32 to vector<1x256xf32>
    %39 = arith.select %17, %33, %38 : vector<1x256xi1>, vector<1x256xf32>
    %40 = arith.addf %37, %39 : vector<1x256xf32>
    %c0_15 = arith.constant 0 : index
    %c0_16 = arith.constant 0 : index
    %41 = vector.load %arg5[%c0_15, %c0_16] : memref<1x256xf32, #tpu.memory_space<vmem>>, vector<1x256xf32>
    tpu.vector_store %arg5[%c0_15, %c0_16], %40 {strides = array<i32>} : memref<1x256xf32, #tpu.memory_space<vmem>>, vector<1x256xf32>,
    %c0_17 = arith.constant 0 : index
    %c0_18 = arith.constant 0 : index
    %42 = vector.load %arg6[%c0_17, %c0_18] : memref<1x256xf32, #tpu.memory_space<vmem>>, vector<1x256xf32>
    %43 = arith.extui %17 : vector<1x256xi1> to vector<1x256xi32>
    %44 = arith.sitofp %43 : vector<1x256xi32> to vector<1x256xf32>
    %45 = arith.addf %42, %44 : vector<1x256xf32>
    %c0_19 = arith.constant 0 : index
    %c0_20 = arith.constant 0 : index
    %46 = vector.load %arg6[%c0_19, %c0_20] : memref<1x256xf32, #tpu.memory_space<vmem>>, vector<1x256xf32>
    tpu.vector_store %arg6[%c0_19, %c0_20], %45 {strides = array<i32>} : memref<1x256xf32, #tpu.memory_space<vmem>>, vector<1x256xf32>,
    %c0_21 = arith.constant 0 : index
    %c0_22 = arith.constant 0 : index
    %47 = vector.load %arg7[%c0_21, %c0_22] : memref<1x256xf32, #tpu.memory_space<vmem>>, vector<1x256xf32>
    %cst_23 = arith.constant 0.000000e+00 : f32
    %48 = vector.broadcast %cst_23 : f32 to vector<1x256xf32>
    %49 = arith.select %17, %36, %48 : vector<1x256xi1>, vector<1x256xf32>
    %50 = arith.addf %47, %49 : vector<1x256xf32>
    %c0_24 = arith.constant 0 : index
    %c0_25 = arith.constant 0 : index
    %51 = vector.load %arg7[%c0_24, %c0_25] : memref<1x256xf32, #tpu.memory_space<vmem>>, vector<1x256xf32>
    tpu.vector_store %arg7[%c0_24, %c0_25], %50 {strides = array<i32>} : memref<1x256xf32, #tpu.memory_space<vmem>>, vector<1x256xf32>,
    %c1_i32 = arith.constant 1 : i32
    %52 = arith.cmpi eq, %arg0, %c1_i32 : i32
    %c0_i32_26 = arith.constant 0 : i32
    %53 = arith.cmpi eq, %arg1, %c0_i32_26 : i32
    %54 = arith.andi %52, %53 : i1
    %55 = arith.extui %54 : i1 to i32
    %c0_i32_27 = arith.constant 0 : i32
    %56 = arith.cmpi ne, %55, %c0_i32_27 : i32
    scf.if %56 {
      %c0_28 = arith.constant 0 : index
      %c0_29 = arith.constant 0 : index
      %57 = vector.load %arg5[%c0_28, %c0_29] : memref<1x256xf32, #tpu.memory_space<vmem>>, vector<1x256xf32>
      %58 = vector.shape_cast %57 : vector<1x256xf32> to vector<1x1x256xf32>
      %cst_30 = arith.constant dense<0.000000e+00> : vector<1xf32>
      %59 = vector.multi_reduction <add>, %58, %cst_30 [1, 2] : vector<1x1x256xf32> to vector<1xf32>
      %60 = vector.shape_cast %59 : vector<1xf32> to vector<1x1x1xf32>
      %61 = vector.extract %60[0, 0, 0] : f32 from vector<1x1x1xf32>
      %62 = vector.broadcast %61 : f32 to vector<1x1xf32>
      %c0_31 = arith.constant 0 : index
      %c0_32 = arith.constant 0 : index
      %63 = vector.load %arg6[%c0_31, %c0_32] : memref<1x256xf32, #tpu.memory_space<vmem>>, vector<1x256xf32>
      %64 = vector.shape_cast %63 : vector<1x256xf32> to vector<1x1x256xf32>
      %cst_33 = arith.constant dense<0.000000e+00> : vector<1xf32>
      %65 = vector.multi_reduction <add>, %64, %cst_33 [1, 2] : vector<1x1x256xf32> to vector<1xf32>
      %66 = vector.shape_cast %65 : vector<1xf32> to vector<1x1x1xf32>
      %67 = vector.extract %66[0, 0, 0] : f32 from vector<1x1x1xf32>
      %68 = vector.broadcast %67 : f32 to vector<1x1xf32>
      %c0_34 = arith.constant 0 : index
      %c0_35 = arith.constant 0 : index
      %69 = vector.load %arg7[%c0_34, %c0_35] : memref<1x256xf32, #tpu.memory_space<vmem>>, vector<1x256xf32>
      %70 = vector.shape_cast %69 : vector<1x256xf32> to vector<1x1x256xf32>
      %cst_36 = arith.constant dense<0.000000e+00> : vector<1xf32>
      %71 = vector.multi_reduction <add>, %70, %cst_36 [1, 2] : vector<1x1x256xf32> to vector<1xf32>
      %72 = vector.shape_cast %71 : vector<1xf32> to vector<1x1x1xf32>
      %73 = vector.extract %72[0, 0, 0] : f32 from vector<1x1x1xf32>
      %74 = vector.broadcast %73 : f32 to vector<1x1xf32>
      %75 = arith.subf %68, %74 : vector<1x1xf32>
      %76 = arith.subf %68, %74 : vector<1x1xf32>
      %77 = arith.divf %62, %68 : vector<1x1xf32>
      %cst_37 = arith.constant 1.000000e+00 : f32
      %78 = vector.broadcast %cst_37 : f32 to vector<1x1xf32>
      %79 = arith.addf %74, %78 : vector<1x1xf32>
      %cst_38 = arith.constant 0.699999988 : f32
      %80 = vector.broadcast %cst_38 : f32 to vector<1x1xf32>
      %81 = arith.mulf %80, %75 : vector<1x1xf32>
      %82 = arith.addf %74, %81 : vector<1x1xf32>
      %cst_39 = arith.constant 3.000000e-01 : f32
      %83 = vector.broadcast %cst_39 : f32 to vector<1x1xf32>
      %84 = arith.mulf %83, %76 : vector<1x1xf32>
      %85 = arith.addf %82, %84 : vector<1x1xf32>
      %cst_40 = arith.constant 1.000000e+00 : f32
      %86 = vector.broadcast %cst_40 : f32 to vector<1x1xf32>
      %87 = arith.addf %85, %86 : vector<1x1xf32>
      %88 = arith.divf %79, %87 : vector<1x1xf32>
      %cst_41 = arith.constant 1.000000e+00 : f32
      %89 = vector.broadcast %cst_41 : f32 to vector<1x1xf32>
      %90 = arith.subf %89, %88 : vector<1x1xf32>
      %cst_42 = arith.constant 8.000000e-01 : f32
      %91 = vector.broadcast %cst_42 : f32 to vector<1x1xf32>
      %92 = math.powf %90, %91 : vector<1x1xf32>
      %93 = arith.addf %77, %92 : vector<1x1xf32>
      %c0_43 = arith.constant 0 : index
      %c0_44 = arith.constant 0 : index
      %94 = vector.load %arg4[%c0_43, %c0_44] : memref<1x1xf32, #tpu.memory_space<vmem>>, vector<1x1xf32>
      tpu.vector_store %arg4[%c0_43, %c0_44], %93 {strides = array<i32>} : memref<1x1xf32, #tpu.memory_space<vmem>>, vector<1x1xf32>,
    } else {
    }
    return
  }
  func.func @transform_0(%arg0: i32, %arg1: i32) -> (i32, i32, i32) {
    %c0_i32 = arith.constant 0 : i32
    %c0_i32_0 = arith.constant 0 : i32
    return %arg0, %c0_i32, %arg1 : i32, i32, i32
  }
  func.func @transform_1(%arg0: i32, %arg1: i32) -> (i32, i32, i32) {
    %c0_i32 = arith.constant 0 : i32
    %c0_i32_0 = arith.constant 0 : i32
    return %arg0, %c0_i32, %arg1 : i32, i32, i32
  }
  func.func @transform_2(%arg0: i32, %arg1: i32) -> (i32, i32) {
    %c0_i32 = arith.constant 0 : i32
    %c0_i32_0 = arith.constant 0 : i32
    %c0_i32_1 = arith.constant 0 : i32
    return %c0_i32, %c0_i32_0 : i32, i32
  }
}

</mosaic_0001>

<bundles_post_ra>
// kernel: tpu_custom_call.1
= control target key start
LH: loop header
LB: loop body
LE: loop exit
PB: predicated region body
PF: predicated region fallthrough
CT: control target
= control target key end

     0   :  { %7 = vsyncpa [#allocation6], 0  ;;  %s1148_s0 = inlined_call_operand.hbm [shape: f32[2,4,256], index: 0, kind: input, shape index: {}]   ;;  %s1149_s1 = inlined_call_operand.hbm [shape: s32[2,1,256], index: 1, kind: input, shape index: {}]   ;;  %s1150_s2 = inlined_call_operand.hbm [shape: f32[1,1], index: 2, kind: output, shape index: {}]  }
   0x1   :  { %9 = vsyncpa [#allocation6 + $0x1], 0 }
   0x2   :  { %10 = vsyncpa [#allocation9], 0 }
   0x3   :  { %12 = vsyncpa [#allocation9 + $0x1], 0 }
   0x4   :  { %13 = vsyncpa [#allocation7], 0  ;;  %s895_s9 = smov 0   ;;  %s897_s10 = smov 0  }
   0x5   :  { %s899_s11 = smov 0   ;;  %s901_s12 = smov 0  }
   0x6   :  { %s903_s13 = smov 0   ;;  %s905_s14 = smov 0  }
   0x7 LB: > { %s582_s15 = sadd.s32 4294967295, %s871_s14   ;;  %s31_s16 = sadd.s32 1, %s867_s13  ;;  %s871_s14 = sphi %s905_s14, %s19_s14   ;;  %s867_s13 = sphi %s903_s13, %s1169_s13   ;;  %s863_s12 = sphi %s901_s12, %s1168_s12   ;;  %s859_s11 = sphi %s899_s11, %s1167_s11   ;;  %s855_s10 = sphi %s897_s10, %s1166_s10   ;;  %s851_s9 = sphi %s895_s9, %s1165_s9  }
   0x8   : > { %p33_p0 = scmp.ge.s32.totalorder %s31_s16, 2  ;;  %s40_s17 = sadd.s32 1, %s859_s11 }
   0x9   : > { %p47_p1 = scmp.ne.s32.totalorder %s859_s11, %s855_s10  ;;  %p48_p2 = scmp.eq.s32.totalorder %s871_s14, 0 }
   0xa   : > { %s1171_s16 = smov (%p33_p0, %s31_s16), 0  ;;  %p53_p4 = scmp.ne.s32.totalorder %s855_s10, %s851_s9 }
   0xb   : > { %p931_p3 = por %p48_p2, %p47_p1  ;;  %s35_s19 = ssub.s32 %s867_s13, %s1171_s16 }
   0xc   : > { %p54_p5 = scmp.eq.s32.totalorder %s582_s15, 0  ;;  %p38_p6 = scmp.eq.s32.totalorder %s35_s19, 0 }
   0xd   : > { %p652_p8 = scmp.lt.s32.totalorder %s871_s14, 2  ;;  %s949_s22 = sand.u32 1, %s859_s11  }
   0xe   : > { %p940_p7 = por %p54_p5, %p53_p4  ;;  %s601_s23 = sshll.u32 %s867_s13, 7 }
   0xf   : > { %s946_s21 = scalar_select %p38_p6, %s859_s11, %s40_s17  }
  0x10   : > { %s1153_s20 = scalar_select %p940_p7, 1, 0 }
  0x11   : > { %s585_s24 = sshll.u32 %s949_s22, 3  ;;  %s956_s27 = scalar_lea.hbm %s1148_s0, %s601_s23 }
  0x12   : > { %s130_s28 = scalar_lea.vmem [#allocation5], %s585_s24  ;;  %p960_p9 = pnand %p652_p8, %p931_p3 }
  0x13   : > { %s140_s29 = sshll.u32 %s130_s28, 4  ;;  %s127_s3 = scalar_lea.sflag [#allocation6], %s949_s22  ;;  %s964_s29 = int_to_ptr.vmem [resolvable:$true] %s140_s29 }
  0x14   : > { %s727_s4 = scalar_lea.hbm %s956_s27, 128  ;;  %p729_p13 = pneg %p960_p9 }
  0x15   : > { %p728_p12 = scmp.ne.s32.totalorder %s956_s27, %s727_s4  ;;  %s732_s7 = scalar_lea.hbm %s1148_s0, 256 }
  0x16   : > { %p733_p2 = scmp.lt.u32.totalorder %s956_s27, %s1148_s0  ;;  %p734_p3 = scmp.lt.u32.totalorder %s732_s7, %s727_s4 }
  0x17   : > { %p730_p0 = pnand %p729_p13, %p728_p12  ;;  %p736_p5 = scmp.lt.u32.totalorder %s727_s4, %s956_s27 }
  0x18   : > { %p735_p4 = por %p734_p3, %p733_p2 }
  0x19   : > { %p731_p1 = pneg %p730_p0 }
  0x1a   : > { %p737_p6 = por %p736_p5, %p735_p4 }
  0x1c   : > { %p738_p8 = pnand %p737_p6, %p731_p1 }
  0x1e   : > { %741 = shalt.err (!%p738_p8)
}
  0x1f   : > { %s742_s17 = scalar_lea.vmem %s964_s29, 128  ;;  %s873_s18 = smov [#allocation5]  }
  0x20   : > { %p743_p12 = scmp.ne.s32.totalorder %s964_s29, %s742_s17  ;;  %s747_s19 = sshll.u32 %s873_s18, 4  ;;  %s748_s19 = int_to_ptr.vmem [resolvable:$false] %s747_s19 }
  0x21   : > { %s749_s23 = scalar_lea.vmem %s748_s19, 256  ;;  %p750_p11 = scmp.lt.s32.totalorder %s964_s29, %s748_s19 }
  0x22   : > { %p745_p0 = pnand %p743_p12, %p729_p13  ;;  %p751_p2 = scmp.lt.s32.totalorder %s749_s23, %s742_s17 }
  0x24   : > { %p746_p10 = pneg %p745_p0  ;;  %p752_p3 = por %p751_p2, %p750_p11 }
  0x26   : > { %p753_p4 = pnand %p752_p3, %p746_p10 }
  0x28   : > { %756 = shalt.err (!%p753_p4)
}
  0x29   : > { %648 = dma.hbm_to_vmem [thread:$0]  (!%p960_p9), %s956_s27, 128, %s964_s29, %s127_s3  }
  0x2a   : > { %p1155_p1 = scmp.lt.s32.totalorder %s871_s14, 3  ;;  %p1156_p5 = scmp.ge.s32.totalorder %s871_s14, 1 }
  0x2b   : > { %s588_s25 = sshll.u32 %s949_s22, 1  ;;  %s602_s26 = sshll.u32 %s867_s13, 5 }
  0x2c   : > { %p998_p6 = pnand %p1156_p5, %p1155_p1  ;;  %s1007_s5 = scalar_lea.hbm %s1149_s1, %s602_s26 }
  0x2d   : > { %s151_s6 = scalar_lea.vmem [#allocation8], %s588_s25  ;;  %s148_s27 = scalar_lea.sflag [#allocation9], %s949_s22 }
  0x2e   : > { %s1157_s24 = scalar_select %p998_p6, 1, 0 }
  0x2f   : > { %s161_s7 = sshll.u32 %s151_s6, 4  ;;  %s757_s29 = scalar_lea.hbm %s1007_s5, 32  ;;  %s162_s7 = int_to_ptr.vmem [resolvable:$true] %s161_s7 }
  0x30   : > { %p758_p10 = scmp.ne.s32.totalorder %s1007_s5, %s757_s29  ;;  %s762_s9 = scalar_lea.hbm %s1149_s1, 64 }
  0x31   : > { %p763_p12 = scmp.lt.u32.totalorder %s1007_s5, %s1149_s1  ;;  %p764_p0 = scmp.lt.u32.totalorder %s762_s9, %s757_s29 }
  0x32   : > { %p760_p11 = pnand %p758_p10, %p729_p13  ;;  %p766_p3 = scmp.lt.u32.totalorder %s757_s29, %s1007_s5 }
  0x33   : > { %p765_p2 = por %p764_p0, %p763_p12 }
  0x34   : > { %p761_p8 = pneg %p760_p11 }
  0x35   : > { %p767_p4 = por %p766_p3, %p765_p2 }
  0x37   : > { %p768_p1 = pnand %p767_p4, %p761_p8 }
  0x39   : > { %771 = shalt.err (!%p768_p1)
}
  0x3a   : > { %s772_s22 = scalar_lea.vmem %s162_s7, 32  ;;  %s874_s19 = smov [#allocation8]  }
  0x3b   : > { %p773_p5 = scmp.ne.s32.totalorder %s162_s7, %s772_s22  ;;  %s777_s23 = sshll.u32 %s874_s19, 4  ;;  %s778_s23 = int_to_ptr.vmem [resolvable:$false] %s777_s23 }
  0x3c   : > { %s779_s25 = scalar_lea.vmem %s778_s23, 64  ;;  %p780_p7 = scmp.lt.s32.totalorder %s162_s7, %s778_s23 }
  0x3d   : > { %p775_p10 = pnand %p773_p5, %p729_p13  ;;  %p781_p6 = scmp.lt.s32.totalorder %s779_s25, %s772_s22 }
  0x3f   : > { %p776_p11 = pneg %p775_p10  ;;  %p782_p0 = por %p781_p6, %p780_p7 }
  0x41   : > { %p783_p12 = pnand %p782_p0, %p776_p11 }
  0x43   : > { %786 = shalt.err (!%p783_p12)
}
  0x44   : > { %651 = dma.hbm_to_vmem [thread:$0]  (!%p960_p9), %s1007_s5, 32, %s162_s7, %s148_s27  }
  0x45   : > { %p1158_p8 = scmp.ne.s32.totalorder %s1157_s24, 0 }
  0x46   : > { %s172_s26 = sand.u32 (!%p1158_p8), 1, %s855_s10   ;;  %p1159_p13 = scmp.ne.s32.totalorder (!%p1158_p8), %s1153_s20, 0 }
  0x47   : > { %170 = sbr.rel (%p1158_p8) target bundleno = 480 (0x1e0), region = 28  ;;  %s592_s28 = sshll.u32 (!%p1158_p8), %s172_s26, 3 }
  0x48   : > { %s173_s4 = scalar_lea.sflag (!%p1158_p8), [#allocation6], %s172_s26  ;;  %s176_s6 = scalar_lea.vmem (!%p1158_p8), [#allocation5], %s592_s28 }
  0x4e   : > { %838 = dma.done.wait (%p1159_p13), %s173_s4, 128  }
  0x4f   : > { %840 = vsyncadd (%p1159_p13), %s173_s4, 4294967168  ;;  %s593_s29 = sshll.u32 %s172_s26, 1  ;;  %s182_s3 = scalar_lea.sflag [#allocation9], %s172_s26 }
  0x50   : > { %s1036_s30 = scalar_lea.vmem [#allocation8], %s593_s29 }
  0x51   : > { %842 = dma.done.wait (%p1159_p13), %s182_s3, 32  }
  0x52   : > { %844 = vsyncadd (%p1159_p13), %s182_s3, 4294967264  ;;  %p208_p7 = scmp.eq.s32.totalorder %s863_s12, 0 }
  0x53   : > { %v214_v0 = vlaneseq (%p208_p7)  ;;  %v875_v1 = vmov (%p208_p7), 0.0  }
  0x54   : > { %213 = sbr.rel (!%p208_p7) target bundleno = 91 (0x5b), region = 40 }
  0x55   : > { %vm216_vm0 = vcmp.lt.s32.totalorder (%p208_p7), %v214_v0, 256 }
  0x56   : > { %218 = vst.msk [vmem:[#allocation2] sm:$0x3] (%p208_p7), %vm216_vm0, %v875_v1  ;;  %219 = vst.msk [vmem:[#allocation3] sm:$0x3] (%p208_p7), %vm216_vm0, %v875_v1 }
  0x57   : > { %220 = vst.msk [vmem:[#allocation4] sm:$0x3] (%p208_p7), %vm216_vm0, %v875_v1 }
  0x5b PF: > { %v221_v2 = vld [vmem:[%s176_s6] sm:$0xff]  ;;  %v239_v3 = vlaneseq  ;;  %v876_v4 = vmov 1966171168   ;;  %p390_p9 = scmp.eq.s32.totalorder %s863_s12, 1  ;;  %v877_v7 = vmov 1   ;;  %vm255_vm1 = vcmask 1043456  }
  0x5c   : > { %v237_v5 = vunpack.c.l.s4 %v876_v4  ;;  %v253_v6 = vcombine.high %v221_v2, %v221_v2  ;;  %v235_v8 = vcombine.low %v877_v7, %v877_v7  ;;  %v256_v11 = vsel %vm255_vm1, %v221_v2, -inf  ;;  %v222_v19 = vld [vmem:[%s1036_s30] sm:$0x3] }
  0x5d   : > { %v240_v10 = vshrl.u32 %v239_v3, 7  ;;  %v257_v13 = vrot.slane %v256_v11, 4  ;;  %vm230_vm2 = vcmp.ne.s32.totalorder %v222_v19, 255  ;;  %v363_v25 = vld [vmem:[#allocation3] sm:$0x3]  ;;  %vm1055_vm5 = vcmp.lt.s32.totalorder %v239_v3, 256 }
  0x5e   : > { %v238_v9 = vunpack.c.0.s8 %v237_v5  ;;  %v263_v12 = vsel %vm255_vm1, %v253_v6, -inf  ;;  %v878_v30 = vmov 0.0   ;;  %vm407_vm8 = vcmask (%p390_p9), 1040384  }
  0x5f   : > { %v264_v14 = vrot.slane %v263_v12, 4  ;;  %v258_v16 = vmax.f32 %v256_v11, %v257_v13  ;;  %v1063_v37 = vsub.s32 0, %v240_v10  ;;  %v1065_v39 = vsub.s32 1, %v240_v10 }
  0x60   : > { %v1046_v15 = vsub.s32 %v238_v9, %v240_v10  ;;  %vm485_vm14 = vcmask (%p390_p9), 0  }
  0x61   : > { %v265_v17 = vmax.f32 %v263_v12, %v264_v14  ;;  %v259_v20 = vrot.slane %v258_v16, 2  ;;  %v303_v40 = vrot.slane %v222_v19, %v1063_v37  ;;  %v307_v41 = vrot.slane %v222_v19, %v1065_v39 }
  0x62   : > { %v242_v18 = vrot.slane %v235_v8, %v1046_v15 }
  0x63   : > { %v266_v21 = vrot.slane %v265_v17, 2  ;;  %v260_v23 = vmax.f32 %v258_v16, %v259_v20  ;;  %vm308_vm6 = vcmp.eq.s32.totalorder %v240_v10, %v303_v40  ;;  %vm309_vm7 = vcmp.eq.s32.totalorder %v240_v10, %v307_v41 }
  0x64   : > { %v249_v22 = vrot.slane %v242_v18, %v1046_v15 }
  0x65   : > { %v267_v24 = vmax.f32 %v265_v17, %v266_v21  ;;  %v261_v27 = vrot.slane %v260_v23, 1 }
  0x66   : > { %vm250_vm3 = vcmp.ne.s32.totalorder %v249_v22, 0 }
  0x67   : > { %vm1051_vm4 = vmand %vm230_vm2, %vm250_vm3  ;;  %v268_v28 = vrot.slane %v267_v24, 1  ;;  %v262_v32 = vmax.f32 %v260_v23, %v261_v27 }
  0x68   : > { %v595_v31 = vsel %vm1051_vm4, 1.0, %v878_v30 }
  0x69   : > { %v269_v33 = vmax.f32 %v267_v24, %v268_v28  ;;  %v366_v34 = vadd.f32 %v595_v31, %v363_v25  ;;  %v337_v24 = vld [vmem:[#allocation2] sm:$0x3] }
  0x6b   : > { %v272_v35 = vcombine.low %v262_v32, %v269_v33  ;;  %367 = vst.msk [vmem:[#allocation3] sm:$0x3] %vm1055_vm5, %v366_v34  ;;  %v368_v34 = vld [vmem:[#allocation4] sm:$0x3] }
  0x6d   : > { %v274_v36 = vsub.f32 %v221_v2, %v272_v35 }
  0x6f   : > { %v275_v38 = vmul.f32 1.442695, %v274_v36  ;;  %v311_v42 = vcombine.high %v274_v36, %v274_v36  ;;  %v313_v43 = vsel %vm308_vm6, %v274_v36, 0.0 }
  0x70   : > { %v315_v46 = vsel %vm255_vm1, %v313_v43, 0.0 }
  0x71   : > { %709 = vpow2.f32 %v275_v38  ;;  %v314_v44 = vsel %vm309_vm7, %v311_v42, 0.0  ;;  %v316_v52 = vrot.slane %v315_v46, 4 }
  0x72   : > { %v322_v50 = vsel %vm255_vm1, %v314_v44, 0.0  ;;  %v421_v26 = vld [vmem:[#allocation3] sm:$0x3] (%p390_p9) }
  0x73   : > { %v323_v55 = vrot.slane %v322_v50, 4  ;;  %v317_v58 = vadd.f32 %v316_v52, %v315_v46  ;;  %v430_v29 = vrot.slane (%p390_p9), %v421_v26, %v1065_v39 }
  0x75   : > { %v324_v61 = vadd.f32 %v323_v55, %v322_v50  ;;  %v318_v0 = vrot.slane %v317_v58, 2 }
  0x77   : > { %v325_v3 = vrot.slane %v324_v61, 2  ;;  %v319_v5 = vadd.f32 %v318_v0, %v317_v58 }
  0x79   : > { %v326_v6 = vadd.f32 %v325_v3, %v324_v61  ;;  %v320_v7 = vrot.slane %v319_v5, 1 }
  0x7b   : > { %v710_v45 = vpop.eup %709  ;;  %v327_v8 = vrot.slane %v326_v6, 1  ;;  %v321_v9 = vadd.f32 %v320_v7, %v319_v5 }
  0x7c   : > { %v278_v47 = vcombine.high %v710_v45, %v710_v45  ;;  %v280_v48 = vsel %vm255_vm1, %v710_v45, 0.0  ;;  %v426_v45 = vrot.slane (%p390_p9), %v421_v26, %v1063_v37 }
  0x7d   : > { %v281_v49 = vrot.slane %v280_v48, 4  ;;  %v328_v12 = vadd.f32 %v327_v8, %v326_v6 }
  0x7e   : > { %v287_v51 = vsel %vm255_vm1, %v278_v47, 0.0  ;;  %v433_v52 = vsel (%p390_p9), %vm407_vm8, %v426_v45, 0.0 }
  0x7f   : > { %v282_v53 = vadd.f32 %v281_v49, %v280_v48  ;;  %v288_v54 = vrot.slane %v287_v51, 4 }
  0x81   : > { %v283_v56 = vrot.slane %v282_v53, 2  ;;  %v289_v57 = vadd.f32 %v288_v54, %v287_v51 }
  0x83   : > { %v284_v59 = vadd.f32 %v283_v56, %v282_v53  ;;  %v290_v60 = vrot.slane %v289_v57, 2  ;;  %v434_v53 = vsel (%p390_p9), %vm407_vm8, %v430_v29, 0.0 }
  0x84   : > { %v435_v54 = vadd.f32 (%p390_p9), %v434_v53, %v433_v52 }
  0x85   : > { %v285_v62 = vrot.slane %v284_v59, 1  ;;  %v291_v63 = vadd.f32 %v290_v60, %v289_v57 }
  0x87   : > { %v286_v1 = vadd.f32 %v285_v62, %v284_v59  ;;  %v292_v2 = vrot.slane %v291_v63, 1 }
  0x89   : > { %v293_v4 = vadd.f32 %v292_v2, %v291_v63  ;;  %711 = vlog2.f32 %v286_v1 }
  0x8b   : > { %713 = vlog2.f32 %v293_v4 }
  0x93   : > { %v712_v10 = vpop.eup %711 }
  0x94   : > { %v295_v11 = vmul.f32 0.6931472, %v712_v10 }
  0x95   : > { %v714_v13 = vpop.eup %713 }
  0x96   : > { %v297_v14 = vmul.f32 0.6931472, %v714_v13  ;;  %v329_v16 = vsub.f32 %v295_v11, %v321_v9 }
  0x98   : > { %v330_v17 = vsub.f32 %v297_v14, %v328_v12  ;;  %v331_v18 = vsub.f32 0.0, %v329_v16 }
  0x9a   : > { %v332_v19 = vsub.f32 0.0, %v330_v17  ;;  %v333_v20 = vmul.f32 1.442695, %v331_v18  ;;  %v340_v21 = vcombine.low %v329_v16, %v330_v17 }
  0x9c   : > { %715 = vpow2.f32 %v333_v20  ;;  %v335_v22 = vmul.f32 1.442695, %v332_v19  ;;  %v347_v23 = vrot.slane %v340_v21, %v1046_v15 }
  0x9e   : > { %717 = vpow2.f32 %v335_v22  ;;  %v354_v25 = vrot.slane %v347_v23, %v1046_v15 }
  0xa0   : > { %v356_v27 = vsel %vm1051_vm4, %v354_v25, 0.0 }
  0xa1   : > { %v357_v28 = vadd.f32 %v356_v27, %v337_v24 }
  0xa3   : > { %362 = vst.msk [vmem:[#allocation2] sm:$0x3] %vm1055_vm5, %v357_v28 }
  0xa6   : > { %v716_v30 = vpop.eup %715 }
  0xa8   : > { %v718_v31 = vpop.eup %717 }
  0xa9   : > { %v371_v32 = vcombine.low %v716_v30, %v718_v31 }
  0xaa   : > { %v395_v41 = vld [vmem:[#allocation2] sm:$0x3] (%p390_p9) }
  0xab   : > { %v378_v33 = vrot.slane %v371_v32, %v1046_v15  ;;  %v400_v44 = vrot.slane (%p390_p9), %v395_v41, %v1063_v37 }
  0xac   : > { %394 = sbr.rel (!%p390_p9) target bundleno = 455 (0x1c7), region = 44 }
  0xad   : > { %v385_v35 = vrot.slane %v378_v33, %v1046_v15  ;;  %v404_v15 = vrot.slane (%p390_p9), %v395_v41, %v1065_v39  ;;  %v408_v48 = vsel (%p390_p9), %vm407_vm8, %v400_v44, 0.0 }
  0xaf   : > { %v387_v36 = vsel %vm1051_vm4, %v385_v35, 0.0  ;;  %v409_v49 = vsel (%p390_p9), %vm407_vm8, %v404_v15, 0.0 }
  0xb0   : > { %v388_v38 = vadd.f32 %v387_v36, %v368_v34  ;;  %v410_v51 = vadd.f32 (%p390_p9), %v409_v49, %v408_v48 }
  0xb2   : > { %389 = vst.msk [vmem:[#allocation4] sm:$0x3] %vm1055_vm5, %v388_v38  ;;  %411 = vadd.xlane.f32.xlu0 (%p390_p9), %v410_v51 }
  0xb6   : > { %436 = vadd.xlane.f32.xlu0 %v435_v54 }
  0xb9   : > { %v446_v40 = vld [vmem:[#allocation4] sm:$0x3] }
  0xba   : > { %v451_v42 = vrot.slane %v446_v40, %v1063_v37  ;;  %v455_v43 = vrot.slane %v446_v40, %v1065_v39 }
  0xbc   : > { %v458_v46 = vsel %vm407_vm8, %v451_v42, 0.0  ;;  %v459_v47 = vsel %vm407_vm8, %v455_v43, 0.0 }
  0xbd   : > { %v460_v50 = vadd.f32 %v459_v47, %v458_v46 }
  0xbf   : > { %461 = vadd.xlane.f32.xlu1 %v460_v50 }
 0x13f   : > { %v412_v39 = vpop.xlane.xlu0 %411 }
 0x140   : > { %v413_v56 = vrot.slane %v412_v39, 4 }
 0x142   : > { %v414_v58 = vadd.f32 %v413_v56, %v412_v39 }
 0x143   : > { %v437_v59 = vpop.xlane.xlu0 %436 }
 0x144   : > { %v415_v61 = vrot.slane %v414_v58, 2  ;;  %v438_v62 = vrot.slane %v437_v59, 4 }
 0x146   : > { %v439_v63 = vadd.f32 %v438_v62, %v437_v59  ;;  %v416_v0 = vadd.f32 %v415_v61, %v414_v58 }
 0x148   : > { %v440_v2 = vrot.slane %v439_v63, 2  ;;  %v417_v3 = vrot.slane %v416_v0, 1 }
 0x14a   : > { %v441_v4 = vadd.f32 %v440_v2, %v439_v63  ;;  %v418_v5 = vadd.f32 %v417_v3, %v416_v0 }
 0x14c   : > { %v462_v37 = vpop.xlane.xlu1 %461  ;;  %605 = vpush %v418_v5  ;;  %v442_v7 = vrot.slane %v441_v4, 1 }
 0x14d   : > { %v463_v55 = vrot.slane %v462_v37, 4 }
 0x14e   : > { %v443_v8 = vadd.f32 %v442_v7, %v441_v4 }
 0x14f   : > { %v464_v57 = vadd.f32 %v463_v55, %v462_v37 }
 0x150   : > { %607 = vpush %v443_v8 }
 0x151   : > { %v465_v60 = vrot.slane %v464_v57, 2 }
 0x153   : > { %v466_v1 = vadd.f32 %v465_v60, %v464_v57 }
 0x155   : > { %v467_v6 = vrot.slane %v466_v1, 1 }
 0x157   : > { %v468_v9 = vadd.f32 %v467_v6, %v466_v1 }
 0x159   : > { %609 = vpush %v468_v9 }
 0x17d   : > { %s1099_s12 = spop %605 }
 0x17e   : > { %v420_v32 = vstv %s1099_s12 }
 0x181   : > { %s608_s20 = spop %607 }
 0x182   : > { %v445_v10 = vstv %s608_s20 }
 0x18a   : > { %s610_s24 = spop %609 }
 0x18b   : > { %v470_v11 = vstv %s610_s24 }
 0x18c   : > { %v471_v12 = vsub.f32 %v445_v10, %v470_v11  ;;  %v474_v19 = vadd.f32 1.0, %v470_v11 }
 0x18e   : > { %v475_v13 = vmul.f32 0.7, %v471_v12  ;;  %v477_v16 = vmul.f32 0.3, %v471_v12 }
 0x190   : > { %v476_v14 = vadd.f32 %v475_v13, %v470_v11 }
 0x192   : > { %v478_v17 = vadd.f32 %v477_v16, %v476_v14 }
 0x194   : > { %v479_v18 = vadd.f32 1.0, %v478_v17 }
 0x196   : > { %719 = vrcp.f32 %v479_v18 }
 0x1a0   : > { %v720_v20 = vpop.eup %719 }
 0x1a1   : > { %v481_v21 = vmul.f32 %v720_v20, %v474_v19 }
 0x1a3   : > { %v482_v22 = vsub.f32 1.0, %v481_v21 }
 0x1a5   : > { %v615_v23 = vand.u32 2147483647, %v482_v22  ;;  %vm619_vm9 = vcmp.lt.f32.partialorder %v482_v22, 0  ;;  %vm620_vm10 = vcmp.eq.f32.partialorder %v482_v22, 0  ;;  %vm632_vm12 = vcmp.ne.f32.partialorder %v482_v22, %v482_v22 }
 0x1a6   : > { %vm621_vm13 = vcmp.eq.f32.partialorder %v482_v22, 1065353216 }
 0x1a7   : > { %721 = vlog2.f32 %v615_v23  ;;  %vm624_vm11 = vcmp.eq.f32.partialorder %v615_v23, 2139095040 }
 0x1b1   : > { %v722_v24 = vpop.eup %721 }
 0x1b2   : > { %v617_v25 = vmul.f32 0.8, %v722_v24 }
 0x1b4   : > { %723 = vpow2.f32 %v617_v25 }
 0x1b5   : > { %725 = vrcp.f32 %v445_v10 }
 0x1be   : > { %v724_v27 = vpop.eup %723 }
 0x1bf   : > { %v726_v28 = vpop.eup %725  ;;  %v625_v30 = vsel %vm619_vm9, 2143289344, %v724_v27 }
 0x1c0   : > { %v626_v31 = vsel %vm620_vm10, 0, %v625_v30  ;;  %v473_v34 = vmul.f32 %v726_v28, %v420_v32 }
 0x1c1   : > { %v631_v33 = vsel %vm624_vm11, 2139095040, %v626_v31 }
 0x1c2   : > { %v635_v35 = vsel %vm632_vm12, 2143289344, %v631_v33 }
 0x1c3   : > { %v636_v36 = vsel %vm621_vm13, 1065353216, %v635_v35 }
 0x1c4   : > { %v484_v38 = vadd.f32 %v636_v36, %v473_v34 }
 0x1c6   : > { %486 = vst.msk [vmem:[#allocation10] sm:$0x1] %vm485_vm14, %v484_v38 }
 0x1c7 PF: > { %p1104_p6 = scmp.eq.s32.totalorder %s582_s15, 1  ;;  %s879_s7 = smov [#allocation10]  }
 0x1c8   : > { %s494_s27 = sshll.u32 %s879_s7, 4  ;;  %s495_s27 = int_to_ptr.vmem [resolvable:$true] %s494_s27 }
 0x1c9   : > { %s787_s8 = scalar_lea.vmem %s495_s27, 16  ;;  %s793_s9 = scalar_lea.vmem %s495_s27, 32 }
 0x1ca   : > { %p788_p2 = scmp.ne.s32.totalorder %s495_s27, %s787_s8  ;;  %p794_p1 = scmp.lt.s32.totalorder %s495_s27, %s495_s27 }
 0x1cb   : > { %p795_p5 = scmp.lt.s32.totalorder %s793_s9, %s787_s8 }
 0x1cc   : > { %p789_p3 = pnand %p788_p2, %p1104_p6 }
 0x1cd   : > { %p796_p10 = por %p795_p5, %p794_p1 }
 0x1ce   : > { %p790_p4 = pneg %p789_p3 }
 0x1d0   : > { %p797_p11 = pnand %p796_p10, %p790_p4 }
 0x1d2   : > { %800 = shalt.err (!%p797_p11)
}
 0x1d3   : > { %s801_s18 = scalar_lea.hbm %s1150_s2, 16 }
 0x1d4   : > { %p802_p0 = scmp.ne.s32.totalorder %s1150_s2, %s801_s18  ;;  %p807_p13 = scmp.lt.u32.totalorder %s801_s18, %s1150_s2 }
 0x1d6   : > { %p803_p12 = pnand %p802_p0, %p1104_p6 }
 0x1d8   : > { %p804_p8 = pneg %p803_p12 }
 0x1da   : > { %p809_p7 = pnand %p807_p13, %p804_p8 }
 0x1dc   : > { %812 = shalt.err (!%p809_p7)
}
 0x1dd   : > { %642 = dma.vmem_to_hbm [thread:$0]  (%p1104_p6), %s495_s27, 16, %s1150_s2, [#allocation7]  }
 0x1de   : > { %846 = dma.done.wait (%p1104_p6), [#allocation7], 16  }
 0x1df   : > { %848 = vsyncadd (%p1104_p6), [#allocation7], 4294967280 }
 0x1e0 PF: > { %s19_s14 = sadd.s32 1, %s871_s14   ;;  %s1165_s9 = smov %s855_s10 }
 0x1e1   : > { %p16_p9 = scmp.ge.s32.totalorder %s19_s14, 4   ;;  %s1166_s10 = smov %s859_s11 }
 0x1e2   : > { %s1167_s11 = smov %s946_s21  ;;  %s1168_s12 = smov %s867_s13 }
 0x1e3   : > { %s1169_s13 = smov %s1171_s16  ;;  %18 = sbr.rel (!%p16_p9) target bundleno = 7 (0x7), region = 86 }
 0x1ea   :  { %507 = vsyncpa [#allocation6], 1 }
 0x1eb   :  { %509 = vsyncpa [#allocation6 + $0x1], 1 }
 0x1ec   :  { %510 = vsyncpa [#allocation9], 1 }
 0x1ed   :  { %512 = vsyncpa [#allocation9 + $0x1], 1 }
 0x1ee   :  { %513 = vsyncpa [#allocation7], 1 }
 0x1ef   :  { %515 = vsyncpa [#allocation7 + $0x1], 1 }

</bundles_post_ra>
